<compile_context>
chip_gen: v5e
topology: v5e:2x2
jax: 0.10.0
libtpu: 0.0.40
codegen_flags: <defaults>
</compile_context>

<pallas_src>
import functools

import numpy as np

import jax
import jax.numpy as jnp
from jax import lax
from jax.experimental import pallas as pl
from jax.experimental.pallas import tpu as pltpu

BN_EPS = 1e-5


# ----------------------------- Pallas kernel -------------------------------
def _block_kernel(x_ref, s1_ref, w1_ref, w3_ref, prm_ref, msk_ref, o_ref,
                  *, H, W, mxu_dtype):
    """branch2 + fused concat/shuffle for nb images, vectorized on sublanes.

    x_ref  : (nb*2c, H*W)   NCHW rows (image-major, channel), spatial in lanes
    s1_ref : (nb*c, nb*2c)  0/1 selector picking the x1 half of every image
    w1_ref : (nb*c, nb*2c)  BN-folded 1x1 conv fused with the x2 selector
    w3_ref : (nb*c, nb*c)   BN-folded 1x1 conv, block-diagonal over images
    prm_ref: (nb*c, 12)     cols 0..8 = BN-folded depthwise taps, 9/10/11 = b1/b2/b3
    msk_ref: (9, H*W)       0/1 border-validity per depthwise tap
    o_ref  : (nb*c, 2*H*W)  row (n,i) = [x1 | branch] == channel-shuffled NCHW
    """
    HW = H * W

    x = x_ref[...]
    xf = x.astype(jnp.float32)
    prm = prm_ref[...].astype(jnp.float32)
    msk = msk_ref[...]

    b1 = prm[:, 9:10]
    b2 = prm[:, 10:11]
    b3 = prm[:, 11:12]

    # Pass-through half gathered into merged (nb*c, HW) layout with one MXU op
    # (exact: the selector is 0/1 and this dot runs in f32 regardless of mxu_dtype).
    x1 = jnp.dot(s1_ref[...], xf, preferred_element_type=jnp.float32)

    # 1x1 conv (+ folded BN) + ReLU for all nb images at once; the x2 selection
    # is fused into the weight so no in-VMEM relayout of x is needed.
    y = jnp.dot(w1_ref[...], x.astype(mxu_dtype),
                preferred_element_type=jnp.float32)
    y = jnp.maximum(y + b1, 0.0)                          # (nb*c, HW) f32

    # Depthwise 3x3 (stride 1, pad 1) + folded BN: 9 lane rolls (XLU slot).
    # Each sublane row is one (image, channel)'s full flattened image, so the
    # roll wraps within that image; wrapped/out-of-bounds lanes are zeroed by
    # the border mask folded into the per-tap scale (no per-tap select).
    z = jnp.broadcast_to(b2, (y.shape[0], HW))
    for k in range(9):
        oy, ox = k // 3 - 1, k % 3 - 1
        off = oy * W + ox                                 # shifted[p] = y[p + off]
        scale = prm[:, k:k + 1] * msk[k:k + 1, :]         # (nb*c, HW)
        src = y if off == 0 else pltpu.roll(y, (-off) % HW, 1)
        z = z + src * scale

    # Final 1x1 conv (+ folded BN) + ReLU, block-diagonal over images.
    o = jnp.dot(w3_ref[...], z.astype(mxu_dtype),
                preferred_element_type=jnp.float32)
    o = jnp.maximum(o + b3, 0.0)

    # Fused concat + channel_shuffle(groups=2): per row the lane layout is
    # [x1_i | branch_i]; both stores are full-lane-width (multiple of 128).
    o_ref[:, pl.ds(0, HW)] = x1.astype(o_ref.dtype)
    o_ref[:, pl.ds(HW, HW)] = o.astype(o_ref.dtype)


# ------------------------------- glue ---------------------------------------
def _fold_bn(gamma, beta, mean, var):
    s = gamma / jnp.sqrt(var + BN_EPS)
    return s, beta - mean * s


def _pick_batch_block(n, c, hw, itemsize, vmem_budget=20 << 20, nbc_cap=256):
    """Images per grid step: as many as VMEM allows (fewer, fatter steps)."""
    fallback = n
    for nb in range(n, 0, -1):
        if n % nb:
            continue
        nbc = nb * c
        if nb != n and nbc % 8:            # (8,128) sublane rule for blocks
            continue
        fallback = nb                      # smallest legal divisor seen
        # double-buffered in+out blocks plus (conservatively doubled) operands
        blk = 2 * (nb * 2 * c * hw + nbc * 2 * hw) * itemsize
        wts = 2 * (2 * nbc * 2 * nbc + nbc * nbc + nbc * 12 + 9 * hw) * 4
        if nbc <= nbc_cap and blk + wts <= vmem_budget:
            return nb
    return fallback


@functools.partial(jax.jit, static_argnames=("mxu_dtype",))
def inverted_residual_forward(x_nchw, p, *, mxu_dtype=jnp.float32):
    """benchmodel=1, stride=1 forward pass (matches the PyTorch module)."""
    N, Ctot, H, W = x_nchw.shape
    c = Ctot // 2
    HW = H * W
    # TODO(synk): if H*W is not a multiple of 128, pad the flattened spatial
    #             axis (and extend msk) in the wrapper to keep lane-dense stores.

    itemsize = jnp.dtype(x_nchw.dtype).itemsize
    nb = _pick_batch_block(N, c, HW, itemsize)
    nbc, nb2c = nb * c, nb * 2 * c
    G = N // nb

    # Fold BN (eval mode) into the conv weights -> single bias per conv.
    s1, t1 = _fold_bn(p["g1"], p["b1"], p["m1"], p["v1"])
    s2, t2 = _fold_bn(p["g2"], p["b2"], p["m2"], p["v2"])
    s3, t3 = _fold_bn(p["g3"], p["b3"], p["m3"], p["v3"])

    w1_bn = p["w1"][:, :, 0, 0] * s1[:, None]                      # (c, c)
    w3_bn = p["w3"][:, :, 0, 0] * s3[:, None]                      # (c, c)
    dw_bn = (p["wd"][:, 0] * s2[:, None, None]).reshape(c, 9)      # (c, 9)

    eye_nb = jnp.eye(nb, dtype=jnp.float32)
    ic = jnp.eye(c, dtype=jnp.float32)
    zc = jnp.zeros((c, c), jnp.float32)
    # x1 selector / x2-selector-fused conv1 / block-diagonal conv3.
    s1_sel = jnp.kron(eye_nb, jnp.concatenate([ic, zc], axis=1))           # (nbc, nb2c)
    w1_sel = jnp.kron(eye_nb, jnp.concatenate([zc, w1_bn], axis=1)).astype(mxu_dtype)
    w3_bd = jnp.kron(eye_nb, w3_bn).astype(mxu_dtype)                      # (nbc, nbc)

    prm = jnp.concatenate(
        [jnp.tile(dw_bn, (nb, 1)),
         jnp.tile(t1.reshape(c, 1), (nb, 1)),
         jnp.tile(t2.reshape(c, 1), (nb, 1)),
         jnp.tile(t3.reshape(c, 1), (nb, 1))],
        axis=1).astype(jnp.float32)                                        # (nbc, 12)

    # Border-validity masks per depthwise tap (static constants, 0/1 f32).
    rows = np.arange(HW) // W
    cols = np.arange(HW) % W
    m = np.zeros((9, HW), np.float32)
    for k in range(9):
        oy, ox = k // 3 - 1, k % 3 - 1
        m[k] = ((rows + oy >= 0) & (rows + oy < H)
                & (cols + ox >= 0) & (cols + ox < W))
    mask9 = jnp.asarray(m)

    # Free, layout-preserving reshape: NCHW -> (N*2c, H*W), image-major rows.
    x_flat = x_nchw.reshape(N * Ctot, HW)

    cost = pl.CostEstimate(
        flops=int(G * HW * (4 * nbc * nb2c + 2 * nbc * nbc + 27 * nbc)),
        transcendentals=0,
        bytes_accessed=int(2 * N * Ctot * HW * itemsize
                           + (2 * nbc * nb2c + nbc * nbc + nbc * 12 + 9 * HW) * 4),
    )

    out = pl.pallas_call(
        functools.partial(_block_kernel, H=H, W=W, mxu_dtype=mxu_dtype),
        out_shape=jax.ShapeDtypeStruct((N * c, 2 * HW), x_nchw.dtype),
        grid=(G,),
        in_specs=[
            pl.BlockSpec((nb2c, HW), lambda g: (g, 0)),       # x (merged rows)
            pl.BlockSpec((nbc, nb2c), lambda g: (0, 0)),      # x1 selector
            pl.BlockSpec((nbc, nb2c), lambda g: (0, 0)),      # conv1 (sel-fused)
            pl.BlockSpec((nbc, nbc), lambda g: (0, 0)),       # conv3 (block-diag)
            pl.BlockSpec((nbc, 12), lambda g: (0, 0)),        # dw taps + biases
            pl.BlockSpec((9, HW), lambda g: (0, 0)),          # tap masks
        ],
        out_specs=pl.BlockSpec((nbc, 2 * HW), lambda g: (g, 0)),
        compiler_params=pltpu.CompilerParams(
            dimension_semantics=("parallel",),
            vmem_limit_bytes=48 * 1024 * 1024),
        cost_estimate=cost,
    )(x_flat, s1_sel, w1_sel, w3_bd, prm, mask9)

    # (N*c, 2*H*W) is byte-identical to the channel-shuffled NCHW output:
    # row (n,i) = [x1_i | branch_i] -> channel 2i = x1_i, 2i+1 = branch_i.
    return out.reshape(N, Ctot, H, W)


# ----------------------- pure-JAX reference (NCHW) --------------------------
def _reference_forward(x, p):
    c = x.shape[1] // 2
    x1, x2 = x[:, :c], x[:, c:]

    def bn(y, g, b, m, v):
        s = (g / jnp.sqrt(v + BN_EPS))[None, :, None, None]
        return (y - m[None, :, None, None]) * s + b[None, :, None, None]

    dn = ("NCHW", "OIHW", "NCHW")
    y = lax.conv_general_dilated(x2, p["w1"], (1, 1), "VALID",
                                 dimension_numbers=dn)
    y = jax.nn.relu(bn(y, p["g1"], p["b1"], p["m1"], p["v1"]))
    z = lax.conv_general_dilated(y, p["wd"], (1, 1), ((1, 1), (1, 1)),
                                 dimension_numbers=dn, feature_group_count=c)
    z = bn(z, p["g2"], p["b2"], p["m2"], p["v2"])
    o = lax.conv_general_dilated(z, p["w3"], (1, 1), "VALID",
                                 dimension_numbers=dn)
    o = jax.nn.relu(bn(o, p["g3"], p["b3"], p["m3"], p["v3"]))

    out = jnp.concatenate([x1, o], axis=1)
    N, C, H, W = out.shape
    out = out.reshape(N, 2, C // 2, H, W).transpose(0, 2, 1, 3, 4)
    return out.reshape(N, C, H, W)


# -------------------------------- main ---------------------------------------
def _make_params(key, c):
    ks = jax.random.split(key, 16)
    u = lambda k, sh: jax.random.uniform(k, sh, jnp.float32, 0.5, 1.5)
    n = lambda k, sh, s=0.3: s * jax.random.normal(k, sh, jnp.float32)
    return {
        "w1": n(ks[0], (c, c, 1, 1)),
        "g1": u(ks[1], (c,)), "b1": n(ks[2], (c,), 0.1),
        "m1": n(ks[3], (c,), 0.1), "v1": u(ks[4], (c,)),
        "wd": n(ks[5], (c, 1, 3, 3)),
        "g2": u(ks[6], (c,)), "b2": n(ks[7], (c,), 0.1),
        "m2": n(ks[8], (c,), 0.1), "v2": u(ks[9], (c,)),
        "w3": n(ks[10], (c, c, 1, 1)),
        "g3": u(ks[11], (c,)), "b3": n(ks[12], (c,), 0.1),
        "m3": n(ks[13], (c,), 0.1), "v3": u(ks[14], (c,)),
    }


if __name__ == "__main__":
    inp = oup = 4          # oup_inc = 2
    N, H, W = 2, 16, 16

    key = jax.random.PRNGKey(0)
    kx, kp = jax.random.split(key)
    x = jax.random.normal(kx, (N, inp, H, W), jnp.float32)
    params = _make_params(kp, oup // 2)

    out = jax.block_until_ready(inverted_residual_forward(x, params))

    ref = _reference_forward(x, params)
    assert out.shape == (N, oup, H, W), out.shape
    assert jnp.allclose(out, ref, atol=1e-4, rtol=1e-4), (
        float(jnp.max(jnp.abs(out - ref))))

    print("KERNEL_OK")
</pallas_src>

<mosaic_0001>
module attributes {stable_mosaic.version = 11 : i64} {
  func.func @_block_kernel(%arg0: i32, %arg1: memref<8x256xf32, #tpu.memory_space<vmem>>, %arg2: memref<4x8xf32, #tpu.memory_space<vmem>>, %arg3: memref<4x8xf32, #tpu.memory_space<vmem>>, %arg4: memref<4x4xf32, #tpu.memory_space<vmem>>, %arg5: memref<4x12xf32, #tpu.memory_space<vmem>>, %arg6: memref<9x256xf32, #tpu.memory_space<vmem>>, %arg7: memref<4x512xf32, #tpu.memory_space<vmem>>) attributes {dimension_semantics = [#tpu.dimension_semantics<parallel>], iteration_bounds = array<i64: 1>, scalar_prefetch = 0 : i64, scratch_operands = 0 : i64, tpu.core_type = #tpu.core_type<tc>, window_params = [{transform_indices = @transform_0, window_bounds = array<i64: 8, 256>}, {pipeline_mode = #tpu.pipeline_mode<synchronous>, transform_indices = @transform_1, window_bounds = array<i64: 4, 8>}, {pipeline_mode = #tpu.pipeline_mode<synchronous>, transform_indices = @transform_2, window_bounds = array<i64: 4, 8>}, {pipeline_mode = #tpu.pipeline_mode<synchronous>, transform_indices = @transform_3, window_bounds = array<i64: 4, 4>}, {pipeline_mode = #tpu.pipeline_mode<synchronous>, transform_indices = @transform_4, window_bounds = array<i64: 4, 12>}, {pipeline_mode = #tpu.pipeline_mode<synchronous>, transform_indices = @transform_5, window_bounds = array<i64: 9, 256>}, {transform_indices = @transform_6, window_bounds = array<i64: 4, 512>}]} {
    %c0 = arith.constant 0 : index
    %c0_0 = arith.constant 0 : index
    %0 = vector.load %arg1[%c0, %c0_0] : memref<8x256xf32, #tpu.memory_space<vmem>>, vector<8x256xf32>
    %c0_1 = arith.constant 0 : index
    %c0_2 = arith.constant 0 : index
    %1 = vector.load %arg5[%c0_1, %c0_2] : memref<4x12xf32, #tpu.memory_space<vmem>>, vector<4x12xf32>
    %c0_3 = arith.constant 0 : index
    %c0_4 = arith.constant 0 : index
    %2 = vector.load %arg6[%c0_3, %c0_4] : memref<9x256xf32, #tpu.memory_space<vmem>>, vector<9x256xf32>
    %3 = vector.extract_strided_slice %1 {offsets = [0, 9], sizes = [4, 1], strides = [1, 1]} : vector<4x12xf32> to vector<4x1xf32>
    %4 = vector.extract_strided_slice %1 {offsets = [0, 10], sizes = [4, 1], strides = [1, 1]} : vector<4x12xf32> to vector<4x1xf32>
    %5 = vector.extract_strided_slice %1 {offsets = [0, 11], sizes = [4, 1], strides = [1, 1]} : vector<4x12xf32> to vector<4x1xf32>
    %c0_5 = arith.constant 0 : index
    %c0_6 = arith.constant 0 : index
    %6 = vector.load %arg2[%c0_5, %c0_6] : memref<4x8xf32, #tpu.memory_space<vmem>>, vector<4x8xf32>
    %cst = arith.constant dense<0.000000e+00> : vector<4x256xf32>
    %7 = tpu.matmul %6, %0, %cst {dimension_numbers = #tpu.dot_dimension_numbers<[1], [0], [0], [1], [0, 0, 1, 1], [], []>} : vector<4x8xf32>, vector<8x256xf32>, vector<4x256xf32> -> vector<4x256xf32>
    %c0_7 = arith.constant 0 : index
    %c0_8 = arith.constant 0 : index
    %8 = vector.load %arg3[%c0_7, %c0_8] : memref<4x8xf32, #tpu.memory_space<vmem>>, vector<4x8xf32>
    %cst_9 = arith.constant dense<0.000000e+00> : vector<4x256xf32>
    %9 = tpu.matmul %8, %0, %cst_9 {dimension_numbers = #tpu.dot_dimension_numbers<[1], [0], [0], [1], [0, 0, 1, 1], [], []>} : vector<4x8xf32>, vector<8x256xf32>, vector<4x256xf32> -> vector<4x256xf32>
    %10 = vector.broadcast %3 : vector<4x1xf32> to vector<4x256xf32>
    %11 = arith.addf %9, %10 : vector<4x256xf32>
    %cst_10 = arith.constant 0.000000e+00 : f32
    %12 = vector.broadcast %cst_10 : f32 to vector<4x256xf32>
    %13 = arith.maximumf %11, %12 : vector<4x256xf32>
    %14 = vector.shape_cast %4 : vector<4x1xf32> to vector<4x1xf32>
    %15 = vector.broadcast %14 : vector<4x1xf32> to vector<4x256xf32>
    %16 = vector.extract_strided_slice %1 {offsets = [0, 0], sizes = [4, 1], strides = [1, 1]} : vector<4x12xf32> to vector<4x1xf32>
    %17 = vector.extract_strided_slice %2 {offsets = [0, 0], sizes = [1, 256], strides = [1, 1]} : vector<9x256xf32> to vector<1x256xf32>
    %18 = vector.broadcast %16 : vector<4x1xf32> to vector<4x256xf32>
    %19 = vector.broadcast %17 : vector<1x256xf32> to vector<4x256xf32>
    %20 = arith.mulf %18, %19 : vector<4x256xf32>
    %c17_i32 = arith.constant 17 : i32
    %21 = tpu.dynamic_rotate %13 by %c17_i32 dim 1 : vector<4x256xf32>, i32 -> vector<4x256xf32>
    %22 = arith.mulf %21, %20 : vector<4x256xf32>
    %23 = arith.addf %15, %22 : vector<4x256xf32>
    %24 = vector.extract_strided_slice %1 {offsets = [0, 1], sizes = [4, 1], strides = [1, 1]} : vector<4x12xf32> to vector<4x1xf32>
    %25 = vector.extract_strided_slice %2 {offsets = [1, 0], sizes = [1, 256], strides = [1, 1]} : vector<9x256xf32> to vector<1x256xf32>
    %26 = vector.broadcast %24 : vector<4x1xf32> to vector<4x256xf32>
    %27 = vector.broadcast %25 : vector<1x256xf32> to vector<4x256xf32>
    %28 = arith.mulf %26, %27 : vector<4x256xf32>
    %c16_i32 = arith.constant 16 : i32
    %29 = tpu.dynamic_rotate %13 by %c16_i32 dim 1 : vector<4x256xf32>, i32 -> vector<4x256xf32>
    %30 = arith.mulf %29, %28 : vector<4x256xf32>
    %31 = arith.addf %23, %30 : vector<4x256xf32>
    %32 = vector.extract_strided_slice %1 {offsets = [0, 2], sizes = [4, 1], strides = [1, 1]} : vector<4x12xf32> to vector<4x1xf32>
    %33 = vector.extract_strided_slice %2 {offsets = [2, 0], sizes = [1, 256], strides = [1, 1]} : vector<9x256xf32> to vector<1x256xf32>
    %34 = vector.broadcast %32 : vector<4x1xf32> to vector<4x256xf32>
    %35 = vector.broadcast %33 : vector<1x256xf32> to vector<4x256xf32>
    %36 = arith.mulf %34, %35 : vector<4x256xf32>
    %c15_i32 = arith.constant 15 : i32
    %37 = tpu.dynamic_rotate %13 by %c15_i32 dim 1 : vector<4x256xf32>, i32 -> vector<4x256xf32>
    %38 = arith.mulf %37, %36 : vector<4x256xf32>
    %39 = arith.addf %31, %38 : vector<4x256xf32>
    %40 = vector.extract_strided_slice %1 {offsets = [0, 3], sizes = [4, 1], strides = [1, 1]} : vector<4x12xf32> to vector<4x1xf32>
    %41 = vector.extract_strided_slice %2 {offsets = [3, 0], sizes = [1, 256], strides = [1, 1]} : vector<9x256xf32> to vector<1x256xf32>
    %42 = vector.broadcast %40 : vector<4x1xf32> to vector<4x256xf32>
    %43 = vector.broadcast %41 : vector<1x256xf32> to vector<4x256xf32>
    %44 = arith.mulf %42, %43 : vector<4x256xf32>
    %c1_i32 = arith.constant 1 : i32
    %45 = tpu.dynamic_rotate %13 by %c1_i32 dim 1 : vector<4x256xf32>, i32 -> vector<4x256xf32>
    %46 = arith.mulf %45, %44 : vector<4x256xf32>
    %47 = arith.addf %39, %46 : vector<4x256xf32>
    %48 = vector.extract_strided_slice %1 {offsets = [0, 4], sizes = [4, 1], strides = [1, 1]} : vector<4x12xf32> to vector<4x1xf32>
    %49 = vector.extract_strided_slice %2 {offsets = [4, 0], sizes = [1, 256], strides = [1, 1]} : vector<9x256xf32> to vector<1x256xf32>
    %50 = vector.broadcast %48 : vector<4x1xf32> to vector<4x256xf32>
    %51 = vector.broadcast %49 : vector<1x256xf32> to vector<4x256xf32>
    %52 = arith.mulf %50, %51 : vector<4x256xf32>
    %53 = arith.mulf %13, %52 : vector<4x256xf32>
    %54 = arith.addf %47, %53 : vector<4x256xf32>
    %55 = vector.extract_strided_slice %1 {offsets = [0, 5], sizes = [4, 1], strides = [1, 1]} : vector<4x12xf32> to vector<4x1xf32>
    %56 = vector.extract_strided_slice %2 {offsets = [5, 0], sizes = [1, 256], strides = [1, 1]} : vector<9x256xf32> to vector<1x256xf32>
    %57 = vector.broadcast %55 : vector<4x1xf32> to vector<4x256xf32>
    %58 = vector.broadcast %56 : vector<1x256xf32> to vector<4x256xf32>
    %59 = arith.mulf %57, %58 : vector<4x256xf32>
    %c255_i32 = arith.constant 255 : i32
    %60 = tpu.dynamic_rotate %13 by %c255_i32 dim 1 : vector<4x256xf32>, i32 -> vector<4x256xf32>
    %61 = arith.mulf %60, %59 : vector<4x256xf32>
    %62 = arith.addf %54, %61 : vector<4x256xf32>
    %63 = vector.extract_strided_slice %1 {offsets = [0, 6], sizes = [4, 1], strides = [1, 1]} : vector<4x12xf32> to vector<4x1xf32>
    %64 = vector.extract_strided_slice %2 {offsets = [6, 0], sizes = [1, 256], strides = [1, 1]} : vector<9x256xf32> to vector<1x256xf32>
    %65 = vector.broadcast %63 : vector<4x1xf32> to vector<4x256xf32>
    %66 = vector.broadcast %64 : vector<1x256xf32> to vector<4x256xf32>
    %67 = arith.mulf %65, %66 : vector<4x256xf32>
    %c241_i32 = arith.constant 241 : i32
    %68 = tpu.dynamic_rotate %13 by %c241_i32 dim 1 : vector<4x256xf32>, i32 -> vector<4x256xf32>
    %69 = arith.mulf %68, %67 : vector<4x256xf32>
    %70 = arith.addf %62, %69 : vector<4x256xf32>
    %71 = vector.extract_strided_slice %1 {offsets = [0, 7], sizes = [4, 1], strides = [1, 1]} : vector<4x12xf32> to vector<4x1xf32>
    %72 = vector.extract_strided_slice %2 {offsets = [7, 0], sizes = [1, 256], strides = [1, 1]} : vector<9x256xf32> to vector<1x256xf32>
    %73 = vector.broadcast %71 : vector<4x1xf32> to vector<4x256xf32>
    %74 = vector.broadcast %72 : vector<1x256xf32> to vector<4x256xf32>
    %75 = arith.mulf %73, %74 : vector<4x256xf32>
    %c240_i32 = arith.constant 240 : i32
    %76 = tpu.dynamic_rotate %13 by %c240_i32 dim 1 : vector<4x256xf32>, i32 -> vector<4x256xf32>
    %77 = arith.mulf %76, %75 : vector<4x256xf32>
    %78 = arith.addf %70, %77 : vector<4x256xf32>
    %79 = vector.extract_strided_slice %1 {offsets = [0, 8], sizes = [4, 1], strides = [1, 1]} : vector<4x12xf32> to vector<4x1xf32>
    %80 = vector.extract_strided_slice %2 {offsets = [8, 0], sizes = [1, 256], strides = [1, 1]} : vector<9x256xf32> to vector<1x256xf32>
    %81 = vector.broadcast %79 : vector<4x1xf32> to vector<4x256xf32>
    %82 = vector.broadcast %80 : vector<1x256xf32> to vector<4x256xf32>
    %83 = arith.mulf %81, %82 : vector<4x256xf32>
    %c239_i32 = arith.constant 239 : i32
    %84 = tpu.dynamic_rotate %13 by %c239_i32 dim 1 : vector<4x256xf32>, i32 -> vector<4x256xf32>
    %85 = arith.mulf %84, %83 : vector<4x256xf32>
    %86 = arith.addf %78, %85 : vector<4x256xf32>
    %c0_11 = arith.constant 0 : index
    %c0_12 = arith.constant 0 : index
    %87 = vector.load %arg4[%c0_11, %c0_12] : memref<4x4xf32, #tpu.memory_space<vmem>>, vector<4x4xf32>
    %cst_13 = arith.constant dense<0.000000e+00> : vector<4x256xf32>
    %88 = tpu.matmul %87, %86, %cst_13 {dimension_numbers = #tpu.dot_dimension_numbers<[1], [0], [0], [1], [0, 0, 1, 1], [], []>} : vector<4x4xf32>, vector<4x256xf32>, vector<4x256xf32> -> vector<4x256xf32>
    %89 = vector.broadcast %5 : vector<4x1xf32> to vector<4x256xf32>
    %90 = arith.addf %88, %89 : vector<4x256xf32>
    %cst_14 = arith.constant 0.000000e+00 : f32
    %91 = vector.broadcast %cst_14 : f32 to vector<4x256xf32>
    %92 = arith.maximumf %90, %91 : vector<4x256xf32>
    %c0_15 = arith.constant 0 : index
    %c0_16 = arith.constant 0 : index
    %93 = vector.load %arg7[%c0_15, %c0_16] : memref<4x512xf32, #tpu.memory_space<vmem>>, vector<4x256xf32>
    tpu.vector_store %arg7[%c0_15, %c0_16], %7 {strides = array<i32>} : memref<4x512xf32, #tpu.memory_space<vmem>>, vector<4x256xf32>,
    %c0_17 = arith.constant 0 : index
    %c256 = arith.constant 256 : index
    %94 = vector.load %arg7[%c0_17, %c256] : memref<4x512xf32, #tpu.memory_space<vmem>>, vector<4x256xf32>
    tpu.vector_store %arg7[%c0_17, %c256], %92 {strides = array<i32>} : memref<4x512xf32, #tpu.memory_space<vmem>>, vector<4x256xf32>,
    return
  }
  func.func @transform_0(%arg0: i32) -> (i32, i32) {
    %c0_i32 = arith.constant 0 : i32
    %c0_i32_0 = arith.constant 0 : i32
    return %arg0, %c0_i32 : i32, i32
  }
  func.func @transform_1(%arg0: i32) -> (i32, i32) {
    %c0_i32 = arith.constant 0 : i32
    %c0_i32_0 = arith.constant 0 : i32
    %c0_i32_1 = arith.constant 0 : i32
    return %c0_i32, %c0_i32_0 : i32, i32
  }
  func.func @transform_2(%arg0: i32) -> (i32, i32) {
    %c0_i32 = arith.constant 0 : i32
    %c0_i32_0 = arith.constant 0 : i32
    %c0_i32_1 = arith.constant 0 : i32
    return %c0_i32, %c0_i32_0 : i32, i32
  }
  func.func @transform_3(%arg0: i32) -> (i32, i32) {
    %c0_i32 = arith.constant 0 : i32
    %c0_i32_0 = arith.constant 0 : i32
    %c0_i32_1 = arith.constant 0 : i32
    return %c0_i32, %c0_i32_0 : i32, i32
  }
  func.func @transform_4(%arg0: i32) -> (i32, i32) {
    %c0_i32 = arith.constant 0 : i32
    %c0_i32_0 = arith.constant 0 : i32
    %c0_i32_1 = arith.constant 0 : i32
    return %c0_i32, %c0_i32_0 : i32, i32
  }
  func.func @transform_5(%arg0: i32) -> (i32, i32) {
    %c0_i32 = arith.constant 0 : i32
    %c0_i32_0 = arith.constant 0 : i32
    %c0_i32_1 = arith.constant 0 : i32
    return %c0_i32, %c0_i32_0 : i32, i32
  }
  func.func @transform_6(%arg0: i32) -> (i32, i32) {
    %c0_i32 = arith.constant 0 : i32
    %c0_i32_0 = arith.constant 0 : i32
    return %arg0, %c0_i32 : i32, i32
  }
}

</mosaic_0001>

<bundles_post_ra>
// kernel: inverted_residual_forward.1
= control target key start
LH: loop header
LB: loop body
LE: loop exit
PB: predicated region body
PF: predicated region fallthrough
CT: control target
= control target key end

     0   :  { %vm31_vm0 = vcmask 64512   ;;  %v413_v3 = vmov 3   ;;  %v414_v4 = vmov 9   ;;  %v415_v6 = vmov 1   ;;  %s425_s29 = smov 127   ;;  %s426_s30 = smov 15   ;;  %s602_s0 = inlined_call_operand.vmem [shape: f32[8,256], index: 0, kind: input, shape index: {}]   ;;  %s603_s2 = inlined_call_operand.vmem [shape: f32[4,8], index: 2, kind: input, shape index: {}]   ;;  %s604_s4 = inlined_call_operand.vmem [shape: f32[4,12], index: 4, kind: input, shape index: {}]   ;;  %s605_s5 = inlined_call_operand.vmem [shape: f32[9,256], index: 5, kind: input, shape index: {}]   ;;  %s606_s1 = inlined_call_operand.vmem [shape: f32[4,8], index: 1, kind: input, shape index: {}]   ;;  %s607_s3 = inlined_call_operand.vmem [shape: f32[4,4], index: 3, kind: input, shape index: {}]   ;;  %s608_s6 = inlined_call_operand.vmem [shape: f32[4,512], index: 6, kind: output, shape index: {}]  }
   0x1   :  { %v23_v0 = vld [vmem:[%s602_s0] sm:$0xff]  ;;  %v24_v1 = vld [vmem:[%s602_s0 + $0x8] sm:$0xff]  ;;  %403 = vset.pattern.permute.xlu1 %v413_v3  ;;  %398 = vset.pattern.permute.xlu0 %v414_v4  ;;  %v416_v7 = vmov 4   ;;  %v417_v8 = vmov 0   ;;  %v418_v9 = vmov 10   ;;  %v419_v10 = vmov 5  }
   0x2   :  { %v75_v2 = vld [vmem:[%s603_s2] sm:$0xf]  ;;  %99 = vmatpush.msra.mxu2 %v23_v0  ;;  %119 = vmatpush.msra.mxu3 %v24_v1  ;;  %v420_v11 = vmov 6   ;;  %v421_v12 = vmov 2   ;;  %s422_s0 = smov 1   ;;  %s423_s2 = smov 16   ;;  %v142_v37 = vlaneseq }
   0x3   :  { %v480_v5 = vld [vmem:[%s604_s4] sm:$0xf]  ;;  %372 = vmatmul.msk.f32.vlgmr.msra.gmra.mxu2 %vm31_vm0, %v75_v2  ;;  %373 = vmatmul.msk.f32.vlgmr.msra.gmra.mxu3 %vm31_vm0, %v75_v2  ;;  %s424_s4 = smov 17   ;;  %s427_s7 = smov 113   ;;  %v429_v20 = vmov 7   ;;  %v431_v21 = vmov 8  }
   0x4   :  { %190 = vperm.xlu1 %403, %v480_v5   ;;  %78 = vperm.xlu0 %398, %v480_v5   ;;  %s428_s8 = smov 112   ;;  %s430_s9 = smov 111   ;;  %v30_v36 = vld [vmem:[%s606_s1] sm:$0xf]  ;;  %v540_v41 = vld [vmem:[%s605_s5 + $0x8] sm:$0xff]  ;;  %v544_v44 = vand.u32 127, %v142_v37 }
   0x5   :  { %400 = vset.pattern.permute.xlu2 %v415_v6  ;;  %70 = vmatpush.msra.mxu1 %v24_v1  ;;  %v535_v40 = vld [vmem:[%s605_s5] sm:$0xff]  ;;  %v135_v43 = vperm.slane %v540_v41, 0  ;;  %v156_v46 = vperm.slane %v540_v41, 1  ;;  %v432_v51 = vmov 11   ;;  %v175_v55 = vperm.slane %v540_v41, 2 }
   0x6   :  { %152 = vperm.xlu2 %400, %v480_v5   ;;  %50 = vmatpush.msra.mxu0 %v23_v0  ;;  %v134_v42 = vperm.slane %v535_v40, 0  ;;  %vm144_vm1 = vcmp.lt.s32.totalorder %v544_v44, 17  ;;  %v155_v45 = vperm.slane %v535_v40, 1  ;;  %vm163_vm2 = vcmp.lt.s32.totalorder %v544_v44, 16 }
   0x7   :  { %371 = vmatmul.msk.f32.vlgmr.msra.gmra.mxu1 %vm31_vm0, %v30_v36  ;;  %370 = vmatmul.msk.f32.vlgmr.msra.gmra.mxu0 %vm31_vm0, %v30_v36  ;;  %v174_v54 = vperm.slane %v535_v40, 2  ;;  %vm182_vm3 = vcmp.lt.s32.totalorder %v544_v44, 15  ;;  %v193_v63 = vperm.slane %v535_v40, 3  ;;  %v212_v0 = vperm.slane %v535_v40, 4 }
   0x8   :  { %vm201_vm4 = vcmp.lt.s32.totalorder %v544_v44, 1  ;;  %vm232_vm5 = vcmp.lt.s32.totalorder %v544_v44, 127  ;;  %v244_v36 = vperm.slane %v540_v41, 6  ;;  %vm251_vm6 = vcmp.lt.s32.totalorder %v544_v44, 113 }
   0x9   :  { %vm270_vm7 = vcmp.lt.s32.totalorder %v544_v44, 112  ;;  %vm289_vm8 = vcmp.lt.s32.totalorder %v544_v44, 111  ;;  %vm305_vm9 = vcmask 1043456   ;;  %v296_v44 = vld [vmem:[%s607_s3] sm:$0xf]  ;;  %vm301_vm10 = vcmask 31744  }
   0xc   :  { %404 = vset.pattern.permute.xlu1 %v416_v7  ;;  %399 = vset.pattern.permute.xlu0 %v417_v8  ;;  %v194_v7 = vperm.slane %v540_v41, 3  ;;  %v213_v8 = vperm.slane %v540_v41, 4 }
   0xd   :  { %209 = vperm.xlu1 %404, %v480_v5   ;;  %131 = vperm.xlu0 %399, %v480_v5  }
   0xe   :  { %401 = vset.pattern.permute.xlu2 %v418_v9 }
   0xf   :  { %127 = vperm.xlu2 %401, %v480_v5  }
  0x15   :  { %402 = vset.pattern.permute.xlu0 %v421_v12 }
  0x16   :  { %171 = vperm.xlu0 %402, %v480_v5  }
  0x17   :  { %405 = vset.pattern.permute.xlu2 %v419_v10 }
  0x18   :  { %221 = vperm.xlu2 %405, %v480_v5  }
  0x1e   :  { %410 = vset.pattern.permute.xlu0 %v432_v51 }
  0x20   :  { %406 = vset.pattern.permute.xlu2 %v420_v11 }
  0x21   :  { %240 = vperm.xlu2 %406, %v480_v5  }
  0x29   :  { %407 = vset.pattern.permute.xlu2 %v429_v20 }
  0x60   :  { %v153_v22 = vpop.permute.xlu2 %152 }
  0x61   :  { %v157_v58 = vmul.f32 %v155_v45, %v153_v22  ;;  %v158_v59 = vmul.f32 %v156_v46, %v153_v22 }
  0x69   :  { %v128_v24 = vpop.permute.xlu2 %127 }
  0x72   :  { %v519_v26 = vpop.permute.xlu2 %221 }
  0x76   :  { %v79_v13 = vpop.permute.xlu0 %78  ;;  %v515_v23 = vpop.permute.xlu1 %190 }
  0x77   :  { %v196_v22 = vmul.f32 %v194_v7, %v515_v23 }
  0x7b   :  { %v521_v29 = vpop.permute.xlu2 %240 }
  0x7f   :  { %v517_v25 = vpop.permute.xlu1 %209  ;;  %v132_v27 = vpop.permute.xlu0 %131 }
  0x80   :  { %v136_v47 = vmul.f32 %v134_v42, %v132_v27  ;;  %v137_v48 = vmul.f32 %v135_v43, %v132_v27  ;;  %v215_v27 = vmul.f32 %v213_v8, %v517_v25 }
  0x86   :  { %v101_v14 = vpop.f32.mrf.mxu2  ;;  %v121_v15 = vpop.f32.mrf.mxu3 }
  0x87   :  { %v102_v16 = vadd.f32 %v101_v14, %v79_v13  ;;  %v122_v17 = vadd.f32 %v121_v15, %v79_v13  ;;  %v214_v15 = vmul.f32 %v212_v0, %v517_v25  ;;  %v262_v25 = vperm.slane %v535_v40, 7 }
  0x88   :  { %v172_v30 = vpop.permute.xlu0 %171 }
  0x89   :  { %v493_v18 = vmax.f32 %v102_v16, 0.0  ;;  %v495_v19 = vmax.f32 %v122_v17, 0.0  ;;  %v176_v3 = vmul.f32 %v174_v54, %v172_v30  ;;  %v177_v4 = vmul.f32 %v175_v55, %v172_v30 }
  0x8a   :  { %v195_v16 = vmul.f32 %v193_v63, %v515_v23  ;;  %v225_v30 = vperm.slane %v540_v41, 5 }
  0x8b   :  { %199 = vrot.lane.b32.xlu0 %v495_v19, %s422_s0  ;;  %159 = vrot.lane.b32.xlu2 %v493_v18, %s423_s2  ;;  %v217_v42 = vmul.f32 %v215_v27, %v495_v19 }
  0x8c   :  { %138 = vrot.lane.b32.xlu1 %v493_v18, %s424_s4  ;;  %v227_v46 = vmul.f32 %v225_v30, %v519_v26 }
  0x93   :  { %228 = vrot.lane.b32.xlu0 %v493_v18, %s425_s29  ;;  %180 = vrot.lane.b32.xlu2 %v495_v19, %s426_s30 }
  0x94   :  { %140 = vrot.lane.b32.xlu1 %v495_v19, %s424_s4 }
  0x9b   :  { %247 = vrot.lane.b32.xlu0 %v493_v18, %s427_s7  ;;  %197 = vrot.lane.b32.xlu2 %v493_v18, %s422_s0 }
  0x9c   :  { %161 = vrot.lane.b32.xlu1 %v495_v19, %s423_s2 }
  0xa3   :  { %266 = vrot.lane.b32.xlu0 %v493_v18, %s428_s8  ;;  %259 = vperm.xlu2 %407, %v480_v5  }
  0xa4   :  { %178 = vrot.lane.b32.xlu1 %v493_v18, %s426_s30 }
  0xab   :  { %285 = vrot.lane.b32.xlu0 %v493_v18, %s430_s9  ;;  %408 = vset.pattern.permute.xlu2 %v431_v21 }
  0xac   :  { %230 = vrot.lane.b32.xlu1 %v495_v19, %s425_s29  ;;  %278 = vperm.xlu2 %408, %v480_v5  }
  0xb4   :  { %249 = vrot.lane.b32.xlu1 %v495_v19, %s427_s7  ;;  %409 = vset.pattern.permute.xlu2 %v432_v51 }
  0xb5   :  { %298 = vperm.xlu2 %409, %v480_v5  }
  0xbc   :  { %268 = vrot.lane.b32.xlu1 %v495_v19, %s428_s8 }
  0xc4   :  { %287 = vrot.lane.b32.xlu1 %v495_v19, %s430_s9  ;;  %v411_v19 = vld [vmem:[%s605_s5 + $0x10] ss:$0 sm:$0xff] }
  0xe5   :  { %v160_v32 = vpop.permute.xlu2 %159 }
  0xed   :  { %v181_v35 = vpop.permute.xlu2 %180 }
  0xf5   :  { %v198_v49 = vpop.permute.xlu2 %197 }
  0xfd   :  { %v523_v33 = vpop.permute.xlu0 %199  ;;  %v260_v14 = vpop.permute.xlu2 %259 }
  0xfe   :  { %v139_v28 = vpop.permute.xlu1 %138  ;;  %v203_v17 = vsel %vm201_vm4, %v523_v33, %v198_v49 }
  0xff   :  { %v204_v37 = vmul.f32 %v203_v17, %v195_v16  ;;  %v52_v17 = vpop.f32.mrf.mxu0 }
 0x105   :  { %v530_v39 = vpop.permute.xlu0 %228 }
 0x106   :  { %v141_v31 = vpop.permute.xlu1 %140  ;;  %v279_v55 = vpop.permute.xlu2 %278 }
 0x107   :  { %v145_v52 = vsel %vm144_vm1, %v139_v28, %v141_v31  ;;  %v146_v53 = vsel %vm144_vm1, %v141_v31, %v139_v28  ;;  %v224_v28 = vperm.slane %v535_v40, 5 }
 0x108   :  { %v147_v60 = vmul.f32 %v146_v53, %v136_v47  ;;  %v148_v61 = vmul.f32 %v145_v52, %v137_v48  ;;  %v264_v53 = vmul.f32 %v262_v25, %v260_v14 }
 0x109   :  { %v226_v43 = vmul.f32 %v224_v28, %v519_v26 }
 0x10a   :  { %v149_v9 = vadd.f32 %v147_v60, %v128_v24  ;;  %v150_v10 = vadd.f32 %v148_v61, %v128_v24  ;;  %v202_v24 = vsel %vm201_vm4, %v198_v49, %v523_v33  ;;  %v263_v33 = vperm.slane %v540_v41, 7 }
 0x10b   :  { %v205_v23 = vmul.f32 %v202_v24, %v196_v22  ;;  %v283_v61 = vmul.f32 %v411_v19, %v279_v55 }
 0x10c   :  { %v265_v54 = vmul.f32 %v263_v33, %v260_v14 }
 0x10d   :  { %v248_v62 = vpop.permute.xlu0 %247 }
 0x10e   :  { %v162_v34 = vpop.permute.xlu1 %161 }
 0x10f   :  { %v164_v56 = vsel %vm163_vm2, %v160_v32, %v162_v34  ;;  %v165_v57 = vsel %vm163_vm2, %v162_v34, %v160_v32  ;;  %v216_v34 = vmul.f32 %v214_v15, %v493_v18  ;;  %v72_v15 = vpop.f32.mrf.mxu1 }
 0x110   :  { %v166_v5 = vmul.f32 %v165_v57, %v157_v58  ;;  %v167_v6 = vmul.f32 %v164_v56, %v158_v59  ;;  %v356_v16 = vrot.slane %v72_v15, 4 }
 0x112   :  { %v168_v20 = vadd.f32 %v166_v5, %v149_v9  ;;  %v169_v21 = vadd.f32 %v167_v6, %v150_v10 }
 0x116   :  { %v179_v38 = vpop.permute.xlu1 %178 }
 0x117   :  { %v183_v1 = vsel %vm182_vm3, %v179_v38, %v181_v35  ;;  %v184_v2 = vsel %vm182_vm3, %v181_v35, %v179_v38  ;;  %v243_v35 = vperm.slane %v535_v40, 6  ;;  %v267_v38 = vpop.permute.xlu0 %266  ;;  %v246_v40 = vmul.f32 %v244_v36, %v521_v29 }
 0x118   :  { %v185_v11 = vmul.f32 %v184_v2, %v176_v3  ;;  %v186_v12 = vmul.f32 %v183_v1, %v177_v4 }
 0x119   :  { %v245_v51 = vmul.f32 %v243_v35, %v521_v29 }
 0x11a   :  { %v187_v31 = vadd.f32 %v185_v11, %v168_v20  ;;  %v188_v32 = vadd.f32 %v186_v12, %v169_v21  ;;  %v357_v20 = vsel %vm305_vm9, %v52_v17, %v356_v16  ;;  %v299_v21 = vpop.permute.xlu2 %298 }
 0x11b   :  { %359 = vst [vmem:[%s608_s6] sm:$0xff] %v357_v20 }
 0x11c   :  { %v206_v47 = vadd.f32 %v204_v37, %v187_v31  ;;  %v207_v48 = vadd.f32 %v205_v23, %v188_v32 }
 0x11e   :  { %v231_v50 = vpop.permute.xlu1 %230  ;;  %v219_v58 = vadd.f32 %v217_v42, %v207_v48  ;;  %v218_v59 = vadd.f32 %v216_v34, %v206_v47 }
 0x11f   :  { %v233_v45 = vsel %vm232_vm5, %v530_v39, %v231_v50  ;;  %v234_v18 = vsel %vm232_vm5, %v231_v50, %v530_v39  ;;  %v412_v39 = vld [vmem:[%s605_s5 + $0x18] ss:$0 sm:$0xff]  ;;  %v286_v3 = vpop.permute.xlu0 %285 }
 0x120   :  { %v235_v26 = vmul.f32 %v233_v45, %v226_v43  ;;  %v236_v50 = vmul.f32 %v234_v18, %v227_v46 }
 0x122   :  { %v237_v63 = vadd.f32 %v235_v26, %v218_v59  ;;  %v238_v0 = vadd.f32 %v236_v50, %v219_v58 }
 0x126   :  { %v250_v13 = vpop.permute.xlu1 %249 }
 0x127   :  { %v252_v41 = vsel %vm251_vm6, %v248_v62, %v250_v13  ;;  %v253_v52 = vsel %vm251_vm6, %v250_v13, %v248_v62  ;;  %v284_v62 = vmul.f32 %v412_v39, %v279_v55 }
 0x128   :  { %v254_v29 = vmul.f32 %v252_v41, %v245_v51  ;;  %v255_v60 = vmul.f32 %v253_v52, %v246_v40 }
 0x12a   :  { %v256_v4 = vadd.f32 %v254_v29, %v237_v63  ;;  %v257_v5 = vadd.f32 %v255_v60, %v238_v0 }
 0x12e   :  { %v269_v49 = vpop.permute.xlu1 %268 }
 0x12f   :  { %v271_v56 = vsel %vm270_vm7, %v267_v38, %v269_v49  ;;  %v272_v57 = vsel %vm270_vm7, %v269_v49, %v267_v38 }
 0x130   :  { %v273_v1 = vmul.f32 %v271_v56, %v264_v53  ;;  %v274_v2 = vmul.f32 %v272_v57, %v265_v54 }
 0x132   :  { %v275_v9 = vadd.f32 %v273_v1, %v256_v4  ;;  %v276_v10 = vadd.f32 %v274_v2, %v257_v5 }
 0x136   :  { %v288_v6 = vpop.permute.xlu1 %287 }
 0x137   :  { %v290_v7 = vsel %vm289_vm8, %v286_v3, %v288_v6  ;;  %v291_v8 = vsel %vm289_vm8, %v288_v6, %v286_v3 }
 0x138   :  { %v292_v11 = vmul.f32 %v290_v7, %v283_v61  ;;  %v293_v12 = vmul.f32 %v291_v8, %v284_v62 }
 0x13a   :  { %v294_v13 = vadd.f32 %v292_v11, %v275_v9  ;;  %v295_v14 = vadd.f32 %v293_v12, %v276_v10 }
 0x13c   :  { %374 = vmatpush.msk.msrb.mxu0 %vm305_vm9, %v294_v13  ;;  %376 = vmatpush.msk.msrb.mxu1 %vm305_vm9, %v295_v14 }
 0x13d   :  { %377 = vmatmul.msk.f32.vlgmr.msrb.gmra.mxu1 %vm301_vm10, %v296_v44  ;;  %375 = vmatmul.msk.f32.vlgmr.msrb.gmra.mxu0 %vm301_vm10, %v296_v44 }
 0x1ba   :  { %v349_v22 = vpop.f32.mrf.mxu1  ;;  %v329_v27 = vpop.f32.mrf.mxu0 }
 0x1bb   :  { %v350_v28 = vadd.f32 %v349_v22, %v299_v21  ;;  %v330_v24 = vadd.f32 %v329_v27, %v299_v21 }
 0x1bd   :  { %v353_v30 = vmax.f32 %v350_v28, 0.0  ;;  %v352_v32 = vmax.f32 %v330_v24, 0.0 }
 0x1bf   :  { %v362_v31 = vrot.slane %v353_v30, 4 }
 0x1c1   :  { %v363_v34 = vsel %vm305_vm9, %v352_v32, %v362_v31 }
 0x1c2   :  { %365 = vst [vmem:[%s608_s6 + $0x8] sm:$0xff] %v363_v34 }

</bundles_post_ra>
